<compile_context>
chip_gen: v5e
topology: v5e:2x2
jax: 0.10.0
libtpu: 0.0.40
codegen_flags: <defaults>
</compile_context>

<pallas_src>
import functools

import jax
import jax.numpy as jnp
from jax.experimental import pallas as pl
from jax.experimental.pallas import tpu as pltpu


# ----------------------------------------------------------------------------
# Tunables / helpers
# ----------------------------------------------------------------------------

def _vmem_limit_bytes():
    """Per-generation scoped-VMEM budget with a conservative fallback."""
    try:
        phys = pltpu.get_tpu_info().vmem_capacity_bytes
        # ~48 MiB on v7x (64 MiB physical), capped at 96 MiB on v5e/v6e (128 MiB).
        return int(min(phys * 3 // 4, 96 * 1024 * 1024))
    except Exception:  # interpret mode / info unavailable
        return 32 * 1024 * 1024


def _compiler_params(n_axes=1):
    return pltpu.CompilerParams(
        dimension_semantics=("parallel",) * n_axes,
        vmem_limit_bytes=_vmem_limit_bytes(),
    )


def _pick_row_tile(m, target=512):
    """Largest row tile <= target, but always >= 2 grid steps (v7x dual-TC)."""
    if m <= 8:
        return m                            # cannot split below the sublane granule
    half = ((-(-m // 2)) + 7) // 8 * 8      # ceil(m/2) rounded up to a multiple of 8
    return min(target, half)


def _resident_spec(block_shape, index_map):
    """Constant-index weight spec, single-buffered to halve its VMEM footprint."""
    try:
        return pl.BlockSpec(block_shape, index_map, pipeline_mode=pl.Buffered(1))
    except TypeError:  # very old Pallas without pipeline_mode kwarg
        return pl.BlockSpec(block_shape, index_map)


# ----------------------------------------------------------------------------
# Kernels
# ----------------------------------------------------------------------------

def _qkv_attention_kernel(x_ref, w_ref, b_ref, o_ref, *, nhead, scale):
    """Fused QKV projection + multi-head self-attention for one batch element.

    x_ref: (1, S, E) f32   w_ref: (3, E, E) bf16   b_ref: (3, 1, E) f32
    o_ref: (1, S, E) bf16  (heads concatenated, pre-out_proj)
    """
    x = x_ref[0].astype(jnp.bfloat16)                                  # (S, E)
    # Three separate projections: no (S, 3E) intermediate, no weight lane-slices.
    q = (jnp.dot(x, w_ref[0], preferred_element_type=jnp.float32) + b_ref[0]) * scale
    k = jnp.dot(x, w_ref[1], preferred_element_type=jnp.float32) + b_ref[1]
    v = jnp.dot(x, w_ref[2], preferred_element_type=jnp.float32) + b_ref[2]
    q = q.astype(jnp.bfloat16)
    k = k.astype(jnp.bfloat16)
    v = v.astype(jnp.bfloat16)

    e = q.shape[-1]
    d = e // nhead
    outs = []
    for h in range(nhead):                      # static unroll (few heads)
        lo = h * d
        qh = q[:, lo:lo + d]                    # (S, D)
        kh = k[:, lo:lo + d]
        vh = v[:, lo:lo + d]
        # q @ k^T without an explicit transpose: contract D of both operands.
        scores = jax.lax.dot_general(
            qh, kh, (((1,), (1,)), ((), ())),
            preferred_element_type=jnp.float32)                       # (S, S) f32
        m = jnp.max(scores, axis=-1, keepdims=True)
        p = jnp.exp(scores - m)                                       # f32 (v5e-safe)
        inv = pl.reciprocal(jnp.sum(p, axis=-1, keepdims=True), approx=True)
        p = (p * inv).astype(jnp.bfloat16)
        oh = jnp.dot(p, vh, preferred_element_type=jnp.float32)
        outs.append(oh.astype(jnp.bfloat16))    # cast now: keeps vreg pressure low
    # Single lane-dense store of all heads.
    o_ref[0] = jnp.concatenate(outs, axis=-1).astype(o_ref.dtype)


def _outproj_res_ln_kernel(a_ref, res_ref, w_ref, b_ref, g_ref, beta_ref, o_ref, *, eps):
    # out = LayerNorm(res + a @ W_out + b_out)   (dropout1 == identity, eval mode)
    y = jnp.dot(a_ref[...], w_ref[...], preferred_element_type=jnp.float32) + b_ref[...]
    z = res_ref[...] + y
    mean = jnp.mean(z, axis=-1, keepdims=True)
    zc = z - mean
    var = jnp.mean(zc * zc, axis=-1, keepdims=True)
    zn = zc * jax.lax.rsqrt(var + eps)
    o_ref[...] = (zn * g_ref[...] + beta_ref[...]).astype(o_ref.dtype)


def _ffn_res_ln_kernel(x_ref, w1_ref, b1_ref, w2_ref, b2_ref, g_ref, beta_ref, o_ref, *, eps):
    # out = LayerNorm(x + conv2(relu(conv1(x))))   (1x1 convs == row-wise MLP)
    x_bf = x_ref[...]                                                  # (TM, E) bf16
    h = jnp.dot(x_bf, w1_ref[...], preferred_element_type=jnp.float32) + b1_ref[...]
    h = jnp.maximum(h, 0.0)
    y = jnp.dot(h.astype(jnp.bfloat16), w2_ref[...],
                preferred_element_type=jnp.float32) + b2_ref[...]
    z = x_bf.astype(jnp.float32) + y                                   # LN math in f32
    mean = jnp.mean(z, axis=-1, keepdims=True)
    zc = z - mean
    var = jnp.mean(zc * zc, axis=-1, keepdims=True)
    zn = zc * jax.lax.rsqrt(var + eps)
    o_ref[...] = (zn * g_ref[...] + beta_ref[...]).astype(o_ref.dtype)


# ----------------------------------------------------------------------------
# Wrappers (pallas_calls)
# ----------------------------------------------------------------------------

def fused_qkv_attention(xb, w_qkv, b_qkv, nhead, scale):
    """xb: (N, S, E) f32 -> attention output (N, S, E) bf16 (pre-out_proj)."""
    Nb, S, E = xb.shape
    blk = pl.BlockSpec((1, S, E), lambda n: (n, 0, 0))
    return pl.pallas_call(
        functools.partial(_qkv_attention_kernel, nhead=nhead, scale=scale),
        grid=(Nb,),
        in_specs=[blk,
                  _resident_spec((3, E, E), lambda n: (0, 0, 0)),
                  pl.BlockSpec((3, 1, E), lambda n: (0, 0, 0))],
        out_specs=blk,
        out_shape=jax.ShapeDtypeStruct((Nb, S, E), jnp.bfloat16),
        compiler_params=_compiler_params(),
    )(xb, w_qkv, b_qkv)


def outproj_residual_layernorm(attn2d, res2d, w_out, b_out, gamma, beta, eps):
    M, E = res2d.shape
    tm = _pick_row_tile(M)
    row = pl.BlockSpec((tm, E), lambda i: (i, 0))
    vec = pl.BlockSpec((1, E), lambda i: (0, 0))
    return pl.pallas_call(
        functools.partial(_outproj_res_ln_kernel, eps=eps),
        grid=(pl.cdiv(M, tm),),
        in_specs=[row, row,
                  _resident_spec((E, E), lambda i: (0, 0)),
                  vec, vec, vec],
        out_specs=row,
        # bf16 inter-kernel activation: halves this HBM write+read; LN2 re-normalizes.
        out_shape=jax.ShapeDtypeStruct((M, E), jnp.bfloat16),
        compiler_params=_compiler_params(),
    )(attn2d, res2d, w_out, b_out.reshape(1, -1),
      gamma.reshape(1, -1), beta.reshape(1, -1))


def ffn_residual_layernorm(x2d, w1, b1, w2, b2, gamma, beta, eps):
    M, E = x2d.shape
    FF = w1.shape[1]
    tm = _pick_row_tile(M)
    row = pl.BlockSpec((tm, E), lambda i: (i, 0))
    vec_e = pl.BlockSpec((1, E), lambda i: (0, 0))
    vec_f = pl.BlockSpec((1, FF), lambda i: (0, 0))
    return pl.pallas_call(
        functools.partial(_ffn_res_ln_kernel, eps=eps),
        grid=(pl.cdiv(M, tm),),
        in_specs=[row,
                  _resident_spec((E, FF), lambda i: (0, 0)), vec_f,
                  _resident_spec((FF, E), lambda i: (0, 0)), vec_e,
                  vec_e, vec_e],
        out_specs=row,
        out_shape=jax.ShapeDtypeStruct((M, E), jnp.float32),
        compiler_params=_compiler_params(),
    )(x2d, w1, b1.reshape(1, -1), w2, b2.reshape(1, -1),
      gamma.reshape(1, -1), beta.reshape(1, -1))


# ----------------------------------------------------------------------------
# Full encoder layer forward
# ----------------------------------------------------------------------------

@functools.partial(jax.jit, static_argnames=("nhead", "eps"))
def transformer_encoder_layer(src, params, nhead, eps=1e-5):
    """src: (S, N, E) float32 — seq-first, like torch MultiheadAttention."""
    S, N, E = src.shape
    D = E // nhead
    scale = float(D) ** -0.5

    # Batch-major view for per-batch attention blocks.  The only XLA-level data
    # movement in the whole layer is this boundary transpose and its inverse.
    xb = src.transpose(1, 0, 2)                                   # (N, S, E)
    x2d = xb.reshape(N * S, E)

    # --- fused QKV projection + multi-head self-attention ---
    attn = fused_qkv_attention(xb, params["w_qkv"], params["b_qkv"], nhead, scale)
    attn2d = attn.reshape(N * S, E)                               # bf16

    # --- out_proj + residual + norm1 (fused) ---
    x1 = outproj_residual_layernorm(attn2d, x2d, params["w_out"], params["b_out"],
                                    params["ln1_g"], params["ln1_b"], eps)  # bf16

    # --- FFN (1x1 convs) + residual + norm2 (fused) ---
    out2d = ffn_residual_layernorm(x1, params["w1"], params["b1"],
                                   params["w2"], params["b2"],
                                   params["ln2_g"], params["ln2_b"], eps)

    return out2d.reshape(N, S, E).transpose(1, 0, 2)


# ----------------------------------------------------------------------------
# Deterministic parameter init
# ----------------------------------------------------------------------------

def init_params(key, d_model, nhead, dim_ff):
    ks = jax.random.split(key, 6)
    s = 0.05
    f32, bf16 = jnp.float32, jnp.bfloat16
    return {
        # q/k/v projection weights stacked (3, E, E), pre-transposed for x @ W,
        # stored bf16 for the MXU.  Biases stacked (3, 1, E) f32.
        "w_qkv": (jax.random.normal(ks[0], (3, d_model, d_model), f32) * s).astype(bf16),
        "b_qkv": jnp.zeros((3, 1, d_model), f32),
        "w_out": (jax.random.normal(ks[1], (d_model, d_model), f32) * s).astype(bf16),
        "b_out": jnp.zeros((d_model,), f32),
        # conv1: torch (dim_ff, d_model, 1, 1) -> W1 (d_model, dim_ff)
        "w1": (jax.random.normal(ks[2], (d_model, dim_ff), f32) * s).astype(bf16),
        "b1": jax.random.normal(ks[3], (dim_ff,), f32) * s,
        # conv2: torch (d_model, dim_ff, 1, 1) -> W2 (dim_ff, d_model)
        "w2": (jax.random.normal(ks[4], (dim_ff, d_model), f32) * s).astype(bf16),
        "b2": jax.random.normal(ks[5], (d_model,), f32) * s,
        "ln1_g": jnp.ones((d_model,), f32),
        "ln1_b": jnp.zeros((d_model,), f32),
        "ln2_g": jnp.ones((d_model,), f32),
        "ln2_b": jnp.zeros((d_model,), f32),
    }


if __name__ == "__main__":
    # Small demo shapes.  # TODO(synk): for real perf, E (and E // nhead) should
    # be padded/packed to >=128 lanes; sub-128 feature dims use masked stores.
    S, N, E, H, FF = 8, 2, 32, 4, 64

    key = jax.random.PRNGKey(0)
    k_src, k_par = jax.random.split(key)
    src = jax.random.normal(k_src, (S, N, E), jnp.float32)
    params = init_params(k_par, E, H, FF)

    out = transformer_encoder_layer(src, params, nhead=H)
    out = jax.block_until_ready(out)

    assert out.shape == (S, N, E)
    assert bool(jnp.all(jnp.isfinite(out)))
    print("KERNEL_OK")
</pallas_src>

<mosaic_0001>
module attributes {stable_mosaic.version = 11 : i64} {
  func.func @_outproj_res_ln_kernel(%arg0: i32, %arg1: memref<8x32xbf16, #tpu.memory_space<vmem>>, %arg2: memref<8x32xf32, #tpu.memory_space<vmem>>, %arg3: memref<32x32xbf16, #tpu.memory_space<vmem>>, %arg4: memref<1x32xf32, #tpu.memory_space<vmem>>, %arg5: memref<1x32xf32, #tpu.memory_space<vmem>>, %arg6: memref<1x32xf32, #tpu.memory_space<vmem>>, %arg7: memref<8x32xbf16, #tpu.memory_space<vmem>>) attributes {dimension_semantics = [#tpu.dimension_semantics<parallel>], iteration_bounds = array<i64: 2>, scalar_prefetch = 0 : i64, scratch_operands = 0 : i64, tpu.core_type = #tpu.core_type<tc>, window_params = [{transform_indices = @transform_0, window_bounds = array<i64: 8, 32>}, {transform_indices = @transform_1, window_bounds = array<i64: 8, 32>}, {pipeline_mode = #tpu.pipeline_mode<synchronous>, transform_indices = @transform_2, window_bounds = array<i64: 32, 32>}, {pipeline_mode = #tpu.pipeline_mode<synchronous>, transform_indices = @transform_3, window_bounds = array<i64: 1, 32>}, {pipeline_mode = #tpu.pipeline_mode<synchronous>, transform_indices = @transform_4, window_bounds = array<i64: 1, 32>}, {pipeline_mode = #tpu.pipeline_mode<synchronous>, transform_indices = @transform_5, window_bounds = array<i64: 1, 32>}, {transform_indices = @transform_6, window_bounds = array<i64: 8, 32>}]} {
    %c0 = arith.constant 0 : index
    %c0_0 = arith.constant 0 : index
    %0 = vector.load %arg1[%c0, %c0_0] : memref<8x32xbf16, #tpu.memory_space<vmem>>, vector<8x32xbf16>
    %c0_1 = arith.constant 0 : index
    %c0_2 = arith.constant 0 : index
    %1 = vector.load %arg3[%c0_1, %c0_2] : memref<32x32xbf16, #tpu.memory_space<vmem>>, vector<32x32xbf16>
    %cst = arith.constant dense<0.000000e+00> : vector<8x32xf32>
    %2 = tpu.matmul %0, %1, %cst {dimension_numbers = #tpu.dot_dimension_numbers<[1], [0], [0], [1], [0, 0, 1, 1], [], []>} : vector<8x32xbf16>, vector<32x32xbf16>, vector<8x32xf32> -> vector<8x32xf32>
    %c0_3 = arith.constant 0 : index
    %c0_4 = arith.constant 0 : index
    %3 = vector.load %arg4[%c0_3, %c0_4] : memref<1x32xf32, #tpu.memory_space<vmem>>, vector<1x32xf32>
    %4 = vector.broadcast %3 : vector<1x32xf32> to vector<8x32xf32>
    %5 = arith.addf %2, %4 : vector<8x32xf32>
    %c0_5 = arith.constant 0 : index
    %c0_6 = arith.constant 0 : index
    %6 = vector.load %arg2[%c0_5, %c0_6] : memref<8x32xf32, #tpu.memory_space<vmem>>, vector<8x32xf32>
    %7 = arith.addf %6, %5 : vector<8x32xf32>
    %cst_7 = arith.constant dense<0.000000e+00> : vector<8xf32>
    %8 = vector.multi_reduction <add>, %7, %cst_7 [1] : vector<8x32xf32> to vector<8xf32>
    %9 = vector.shape_cast %8 : vector<8xf32> to vector<8x1xf32>
    %cst_8 = arith.constant 3.200000e+01 : f32
    %10 = vector.broadcast %cst_8 : f32 to vector<8x1xf32>
    %11 = arith.divf %9, %10 : vector<8x1xf32>
    %12 = vector.broadcast %11 : vector<8x1xf32> to vector<8x32xf32>
    %13 = arith.subf %7, %12 : vector<8x32xf32>
    %14 = arith.mulf %13, %13 : vector<8x32xf32>
    %cst_9 = arith.constant dense<0.000000e+00> : vector<8xf32>
    %15 = vector.multi_reduction <add>, %14, %cst_9 [1] : vector<8x32xf32> to vector<8xf32>
    %16 = vector.shape_cast %15 : vector<8xf32> to vector<8x1xf32>
    %cst_10 = arith.constant 3.200000e+01 : f32
    %17 = vector.broadcast %cst_10 : f32 to vector<8x1xf32>
    %18 = arith.divf %16, %17 : vector<8x1xf32>
    %cst_11 = arith.constant 9.99999974E-6 : f32
    %19 = vector.broadcast %cst_11 : f32 to vector<8x1xf32>
    %20 = arith.addf %18, %19 : vector<8x1xf32>
    %21 = math.rsqrt %20 : vector<8x1xf32>
    %22 = vector.broadcast %21 : vector<8x1xf32> to vector<8x32xf32>
    %23 = arith.mulf %13, %22 : vector<8x32xf32>
    %c0_12 = arith.constant 0 : index
    %c0_13 = arith.constant 0 : index
    %24 = vector.load %arg5[%c0_12, %c0_13] : memref<1x32xf32, #tpu.memory_space<vmem>>, vector<1x32xf32>
    %25 = vector.broadcast %24 : vector<1x32xf32> to vector<8x32xf32>
    %26 = arith.mulf %23, %25 : vector<8x32xf32>
    %c0_14 = arith.constant 0 : index
    %c0_15 = arith.constant 0 : index
    %27 = vector.load %arg6[%c0_14, %c0_15] : memref<1x32xf32, #tpu.memory_space<vmem>>, vector<1x32xf32>
    %28 = vector.broadcast %27 : vector<1x32xf32> to vector<8x32xf32>
    %29 = arith.addf %26, %28 : vector<8x32xf32>
    %30 = arith.truncf %29 : vector<8x32xf32> to vector<8x32xbf16>
    %c0_16 = arith.constant 0 : index
    %c0_17 = arith.constant 0 : index
    %31 = vector.load %arg7[%c0_16, %c0_17] : memref<8x32xbf16, #tpu.memory_space<vmem>>, vector<8x32xbf16>
    tpu.vector_store %arg7[%c0_16, %c0_17], %30 {strides = array<i32>} : memref<8x32xbf16, #tpu.memory_space<vmem>>, vector<8x32xbf16>,
    return
  }
  func.func @transform_0(%arg0: i32) -> (i32, i32) {
    %c0_i32 = arith.constant 0 : i32
    %c0_i32_0 = arith.constant 0 : i32
    return %arg0, %c0_i32 : i32, i32
  }
  func.func @transform_1(%arg0: i32) -> (i32, i32) {
    %c0_i32 = arith.constant 0 : i32
    %c0_i32_0 = arith.constant 0 : i32
    return %arg0, %c0_i32 : i32, i32
  }
  func.func @transform_2(%arg0: i32) -> (i32, i32) {
    %c0_i32 = arith.constant 0 : i32
    %c0_i32_0 = arith.constant 0 : i32
    %c0_i32_1 = arith.constant 0 : i32
    return %c0_i32, %c0_i32_0 : i32, i32
  }
  func.func @transform_3(%arg0: i32) -> (i32, i32) {
    %c0_i32 = arith.constant 0 : i32
    %c0_i32_0 = arith.constant 0 : i32
    %c0_i32_1 = arith.constant 0 : i32
    return %c0_i32, %c0_i32_0 : i32, i32
  }
  func.func @transform_4(%arg0: i32) -> (i32, i32) {
    %c0_i32 = arith.constant 0 : i32
    %c0_i32_0 = arith.constant 0 : i32
    %c0_i32_1 = arith.constant 0 : i32
    return %c0_i32, %c0_i32_0 : i32, i32
  }
  func.func @transform_5(%arg0: i32) -> (i32, i32) {
    %c0_i32 = arith.constant 0 : i32
    %c0_i32_0 = arith.constant 0 : i32
    %c0_i32_1 = arith.constant 0 : i32
    return %c0_i32, %c0_i32_0 : i32, i32
  }
  func.func @transform_6(%arg0: i32) -> (i32, i32) {
    %c0_i32 = arith.constant 0 : i32
    %c0_i32_0 = arith.constant 0 : i32
    return %arg0, %c0_i32 : i32, i32
  }
}

module attributes {stable_mosaic.version = 11 : i64} {
  func.func @_qkv_attention_kernel(%arg0: i32, %arg1: memref<1x8x32xf32, #tpu.memory_space<vmem>>, %arg2: memref<3x32x32xbf16, #tpu.memory_space<vmem>>, %arg3: memref<3x1x32xf32, #tpu.memory_space<vmem>>, %arg4: memref<1x8x32xbf16, #tpu.memory_space<vmem>>) attributes {dimension_semantics = [#tpu.dimension_semantics<parallel>], iteration_bounds = array<i64: 2>, scalar_prefetch = 0 : i64, scratch_operands = 0 : i64, tpu.core_type = #tpu.core_type<tc>, window_params = [{transform_indices = @transform_0, window_bounds = array<i64: 1, 8, 32>}, {pipeline_mode = #tpu.pipeline_mode<synchronous>, transform_indices = @transform_1, window_bounds = array<i64: 3, 32, 32>}, {pipeline_mode = #tpu.pipeline_mode<synchronous>, transform_indices = @transform_2, window_bounds = array<i64: 3, 1, 32>}, {transform_indices = @transform_3, window_bounds = array<i64: 1, 8, 32>}]} {
    %c0 = arith.constant 0 : index
    %c0_0 = arith.constant 0 : index
    %c0_1 = arith.constant 0 : index
    %0 = vector.load %arg1[%c0, %c0_0, %c0_1] : memref<1x8x32xf32, #tpu.memory_space<vmem>>, vector<1x8x32xf32>
    %1 = vector.shape_cast %0 : vector<1x8x32xf32> to vector<8x32xf32>
    %2 = arith.truncf %1 : vector<8x32xf32> to vector<8x32xbf16>
    %c0_2 = arith.constant 0 : index
    %c0_3 = arith.constant 0 : index
    %c0_4 = arith.constant 0 : index
    %3 = vector.load %arg2[%c0_2, %c0_3, %c0_4] : memref<3x32x32xbf16, #tpu.memory_space<vmem>>, vector<1x32x32xbf16>
    %4 = vector.shape_cast %3 : vector<1x32x32xbf16> to vector<32x32xbf16>
    %cst = arith.constant dense<0.000000e+00> : vector<8x32xf32>
    %5 = tpu.matmul %2, %4, %cst {dimension_numbers = #tpu.dot_dimension_numbers<[1], [0], [0], [1], [0, 0, 1, 1], [], []>} : vector<8x32xbf16>, vector<32x32xbf16>, vector<8x32xf32> -> vector<8x32xf32>
    %c0_5 = arith.constant 0 : index
    %c0_6 = arith.constant 0 : index
    %c0_7 = arith.constant 0 : index
    %6 = vector.load %arg3[%c0_5, %c0_6, %c0_7] : memref<3x1x32xf32, #tpu.memory_space<vmem>>, vector<1x1x32xf32>
    %7 = vector.shape_cast %6 : vector<1x1x32xf32> to vector<1x32xf32>
    %8 = vector.broadcast %7 : vector<1x32xf32> to vector<8x32xf32>
    %9 = arith.addf %5, %8 : vector<8x32xf32>
    %cst_8 = arith.constant 0.353553385 : f32
    %10 = vector.broadcast %cst_8 : f32 to vector<8x32xf32>
    %11 = arith.mulf %9, %10 : vector<8x32xf32>
    %c1 = arith.constant 1 : index
    %c0_9 = arith.constant 0 : index
    %c0_10 = arith.constant 0 : index
    %12 = vector.load %arg2[%c1, %c0_9, %c0_10] : memref<3x32x32xbf16, #tpu.memory_space<vmem>>, vector<1x32x32xbf16>
    %13 = vector.shape_cast %12 : vector<1x32x32xbf16> to vector<32x32xbf16>
    %cst_11 = arith.constant dense<0.000000e+00> : vector<8x32xf32>
    %14 = tpu.matmul %2, %13, %cst_11 {dimension_numbers = #tpu.dot_dimension_numbers<[1], [0], [0], [1], [0, 0, 1, 1], [], []>} : vector<8x32xbf16>, vector<32x32xbf16>, vector<8x32xf32> -> vector<8x32xf32>
    %c1_12 = arith.constant 1 : index
    %c0_13 = arith.constant 0 : index
    %c0_14 = arith.constant 0 : index
    %15 = vector.load %arg3[%c1_12, %c0_13, %c0_14] : memref<3x1x32xf32, #tpu.memory_space<vmem>>, vector<1x1x32xf32>
    %16 = vector.shape_cast %15 : vector<1x1x32xf32> to vector<1x32xf32>
    %17 = vector.broadcast %16 : vector<1x32xf32> to vector<8x32xf32>
    %18 = arith.addf %14, %17 : vector<8x32xf32>
    %c2 = arith.constant 2 : index
    %c0_15 = arith.constant 0 : index
    %c0_16 = arith.constant 0 : index
    %19 = vector.load %arg2[%c2, %c0_15, %c0_16] : memref<3x32x32xbf16, #tpu.memory_space<vmem>>, vector<1x32x32xbf16>
    %20 = vector.shape_cast %19 : vector<1x32x32xbf16> to vector<32x32xbf16>
    %cst_17 = arith.constant dense<0.000000e+00> : vector<8x32xf32>
    %21 = tpu.matmul %2, %20, %cst_17 {dimension_numbers = #tpu.dot_dimension_numbers<[1], [0], [0], [1], [0, 0, 1, 1], [], []>} : vector<8x32xbf16>, vector<32x32xbf16>, vector<8x32xf32> -> vector<8x32xf32>
    %c2_18 = arith.constant 2 : index
    %c0_19 = arith.constant 0 : index
    %c0_20 = arith.constant 0 : index
    %22 = vector.load %arg3[%c2_18, %c0_19, %c0_20] : memref<3x1x32xf32, #tpu.memory_space<vmem>>, vector<1x1x32xf32>
    %23 = vector.shape_cast %22 : vector<1x1x32xf32> to vector<1x32xf32>
    %24 = vector.broadcast %23 : vector<1x32xf32> to vector<8x32xf32>
    %25 = arith.addf %21, %24 : vector<8x32xf32>
    %26 = arith.truncf %11 : vector<8x32xf32> to vector<8x32xbf16>
    %27 = arith.truncf %18 : vector<8x32xf32> to vector<8x32xbf16>
    %28 = arith.truncf %25 : vector<8x32xf32> to vector<8x32xbf16>
    %29 = vector.extract_strided_slice %26 {offsets = [0, 0], sizes = [8, 8], strides = [1, 1]} : vector<8x32xbf16> to vector<8x8xbf16>
    %30 = vector.extract_strided_slice %27 {offsets = [0, 0], sizes = [8, 8], strides = [1, 1]} : vector<8x32xbf16> to vector<8x8xbf16>
    %31 = vector.extract_strided_slice %28 {offsets = [0, 0], sizes = [8, 8], strides = [1, 1]} : vector<8x32xbf16> to vector<8x8xbf16>
    %cst_21 = arith.constant dense<0.000000e+00> : vector<8x8xf32>
    %32 = tpu.matmul %29, %30, %cst_21 {dimension_numbers = #tpu.dot_dimension_numbers<[1], [1], [0], [0], [0, 0, 1, 0], [], []>} : vector<8x8xbf16>, vector<8x8xbf16>, vector<8x8xf32> -> vector<8x8xf32>
    %cst_22 = arith.constant dense<0xFF800000> : vector<8xf32>
    %33 = vector.multi_reduction <maximumf>, %32, %cst_22 [1] : vector<8x8xf32> to vector<8xf32>
    %34 = vector.shape_cast %33 : vector<8xf32> to vector<8x1xf32>
    %35 = vector.broadcast %34 : vector<8x1xf32> to vector<8x8xf32>
    %36 = arith.subf %32, %35 : vector<8x8xf32>
    %37 = math.exp %36 : vector<8x8xf32>
    %cst_23 = arith.constant dense<0.000000e+00> : vector<8xf32>
    %38 = vector.multi_reduction <add>, %37, %cst_23 [1] : vector<8x8xf32> to vector<8xf32>
    %39 = vector.shape_cast %38 : vector<8xf32> to vector<8x1xf32>
    %40 = tpu.reciprocal %39 {approx = true} : vector<8x1xf32> -> vector<8x1xf32>
    %41 = vector.broadcast %40 : vector<8x1xf32> to vector<8x8xf32>
    %42 = arith.mulf %37, %41 : vector<8x8xf32>
    %43 = arith.truncf %42 : vector<8x8xf32> to vector<8x8xbf16>
    %cst_24 = arith.constant dense<0.000000e+00> : vector<8x8xf32>
    %44 = tpu.matmul %43, %31, %cst_24 {dimension_numbers = #tpu.dot_dimension_numbers<[1], [0], [0], [1], [0, 0, 1, 1], [], []>} : vector<8x8xbf16>, vector<8x8xbf16>, vector<8x8xf32> -> vector<8x8xf32>
    %45 = arith.truncf %44 : vector<8x8xf32> to vector<8x8xbf16>
    %46 = vector.extract_strided_slice %26 {offsets = [0, 8], sizes = [8, 8], strides = [1, 1]} : vector<8x32xbf16> to vector<8x8xbf16>
    %47 = vector.extract_strided_slice %27 {offsets = [0, 8], sizes = [8, 8], strides = [1, 1]} : vector<8x32xbf16> to vector<8x8xbf16>
    %48 = vector.extract_strided_slice %28 {offsets = [0, 8], sizes = [8, 8], strides = [1, 1]} : vector<8x32xbf16> to vector<8x8xbf16>
    %cst_25 = arith.constant dense<0.000000e+00> : vector<8x8xf32>
    %49 = tpu.matmul %46, %47, %cst_25 {dimension_numbers = #tpu.dot_dimension_numbers<[1], [1], [0], [0], [0, 0, 1, 0], [], []>} : vector<8x8xbf16>, vector<8x8xbf16>, vector<8x8xf32> -> vector<8x8xf32>
    %cst_26 = arith.constant dense<0xFF800000> : vector<8xf32>
    %50 = vector.multi_reduction <maximumf>, %49, %cst_26 [1] : vector<8x8xf32> to vector<8xf32>
    %51 = vector.shape_cast %50 : vector<8xf32> to vector<8x1xf32>
    %52 = vector.broadcast %51 : vector<8x1xf32> to vector<8x8xf32>
    %53 = arith.subf %49, %52 : vector<8x8xf32>
    %54 = math.exp %53 : vector<8x8xf32>
    %cst_27 = arith.constant dense<0.000000e+00> : vector<8xf32>
    %55 = vector.multi_reduction <add>, %54, %cst_27 [1] : vector<8x8xf32> to vector<8xf32>
    %56 = vector.shape_cast %55 : vector<8xf32> to vector<8x1xf32>
    %57 = tpu.reciprocal %56 {approx = true} : vector<8x1xf32> -> vector<8x1xf32>
    %58 = vector.broadcast %57 : vector<8x1xf32> to vector<8x8xf32>
    %59 = arith.mulf %54, %58 : vector<8x8xf32>
    %60 = arith.truncf %59 : vector<8x8xf32> to vector<8x8xbf16>
    %cst_28 = arith.constant dense<0.000000e+00> : vector<8x8xf32>
    %61 = tpu.matmul %60, %48, %cst_28 {dimension_numbers = #tpu.dot_dimension_numbers<[1], [0], [0], [1], [0, 0, 1, 1], [], []>} : vector<8x8xbf16>, vector<8x8xbf16>, vector<8x8xf32> -> vector<8x8xf32>
    %62 = arith.truncf %61 : vector<8x8xf32> to vector<8x8xbf16>
    %63 = vector.extract_strided_slice %26 {offsets = [0, 16], sizes = [8, 8], strides = [1, 1]} : vector<8x32xbf16> to vector<8x8xbf16>
    %64 = vector.extract_strided_slice %27 {offsets = [0, 16], sizes = [8, 8], strides = [1, 1]} : vector<8x32xbf16> to vector<8x8xbf16>
    %65 = vector.extract_strided_slice %28 {offsets = [0, 16], sizes = [8, 8], strides = [1, 1]} : vector<8x32xbf16> to vector<8x8xbf16>
    %cst_29 = arith.constant dense<0.000000e+00> : vector<8x8xf32>
    %66 = tpu.matmul %63, %64, %cst_29 {dimension_numbers = #tpu.dot_dimension_numbers<[1], [1], [0], [0], [0, 0, 1, 0], [], []>} : vector<8x8xbf16>, vector<8x8xbf16>, vector<8x8xf32> -> vector<8x8xf32>
    %cst_30 = arith.constant dense<0xFF800000> : vector<8xf32>
    %67 = vector.multi_reduction <maximumf>, %66, %cst_30 [1] : vector<8x8xf32> to vector<8xf32>
    %68 = vector.shape_cast %67 : vector<8xf32> to vector<8x1xf32>
    %69 = vector.broadcast %68 : vector<8x1xf32> to vector<8x8xf32>
    %70 = arith.subf %66, %69 : vector<8x8xf32>
    %71 = math.exp %70 : vector<8x8xf32>
    %cst_31 = arith.constant dense<0.000000e+00> : vector<8xf32>
    %72 = vector.multi_reduction <add>, %71, %cst_31 [1] : vector<8x8xf32> to vector<8xf32>
    %73 = vector.shape_cast %72 : vector<8xf32> to vector<8x1xf32>
    %74 = tpu.reciprocal %73 {approx = true} : vector<8x1xf32> -> vector<8x1xf32>
    %75 = vector.broadcast %74 : vector<8x1xf32> to vector<8x8xf32>
    %76 = arith.mulf %71, %75 : vector<8x8xf32>
    %77 = arith.truncf %76 : vector<8x8xf32> to vector<8x8xbf16>
    %cst_32 = arith.constant dense<0.000000e+00> : vector<8x8xf32>
    %78 = tpu.matmul %77, %65, %cst_32 {dimension_numbers = #tpu.dot_dimension_numbers<[1], [0], [0], [1], [0, 0, 1, 1], [], []>} : vector<8x8xbf16>, vector<8x8xbf16>, vector<8x8xf32> -> vector<8x8xf32>
    %79 = arith.truncf %78 : vector<8x8xf32> to vector<8x8xbf16>
    %80 = vector.extract_strided_slice %26 {offsets = [0, 24], sizes = [8, 8], strides = [1, 1]} : vector<8x32xbf16> to vector<8x8xbf16>
    %81 = vector.extract_strided_slice %27 {offsets = [0, 24], sizes = [8, 8], strides = [1, 1]} : vector<8x32xbf16> to vector<8x8xbf16>
    %82 = vector.extract_strided_slice %28 {offsets = [0, 24], sizes = [8, 8], strides = [1, 1]} : vector<8x32xbf16> to vector<8x8xbf16>
    %cst_33 = arith.constant dense<0.000000e+00> : vector<8x8xf32>
    %83 = tpu.matmul %80, %81, %cst_33 {dimension_numbers = #tpu.dot_dimension_numbers<[1], [1], [0], [0], [0, 0, 1, 0], [], []>} : vector<8x8xbf16>, vector<8x8xbf16>, vector<8x8xf32> -> vector<8x8xf32>
    %cst_34 = arith.constant dense<0xFF800000> : vector<8xf32>
    %84 = vector.multi_reduction <maximumf>, %83, %cst_34 [1] : vector<8x8xf32> to vector<8xf32>
    %85 = vector.shape_cast %84 : vector<8xf32> to vector<8x1xf32>
    %86 = vector.broadcast %85 : vector<8x1xf32> to vector<8x8xf32>
    %87 = arith.subf %83, %86 : vector<8x8xf32>
    %88 = math.exp %87 : vector<8x8xf32>
    %cst_35 = arith.constant dense<0.000000e+00> : vector<8xf32>
    %89 = vector.multi_reduction <add>, %88, %cst_35 [1] : vector<8x8xf32> to vector<8xf32>
    %90 = vector.shape_cast %89 : vector<8xf32> to vector<8x1xf32>
    %91 = tpu.reciprocal %90 {approx = true} : vector<8x1xf32> -> vector<8x1xf32>
    %92 = vector.broadcast %91 : vector<8x1xf32> to vector<8x8xf32>
    %93 = arith.mulf %88, %92 : vector<8x8xf32>
    %94 = arith.truncf %93 : vector<8x8xf32> to vector<8x8xbf16>
    %cst_36 = arith.constant dense<0.000000e+00> : vector<8x8xf32>
    %95 = tpu.matmul %94, %82, %cst_36 {dimension_numbers = #tpu.dot_dimension_numbers<[1], [0], [0], [1], [0, 0, 1, 1], [], []>} : vector<8x8xbf16>, vector<8x8xbf16>, vector<8x8xf32> -> vector<8x8xf32>
    %96 = arith.truncf %95 : vector<8x8xf32> to vector<8x8xbf16>
    %97 = tpu.concatenate %45, %62, %79, %96 in 1 : vector<8x8xbf16>, vector<8x8xbf16>, vector<8x8xbf16>, vector<8x8xbf16> -> vector<8x32xbf16>
    %c0_37 = arith.constant 0 : index
    %c0_38 = arith.constant 0 : index
    %c0_39 = arith.constant 0 : index
    %98 = vector.load %arg4[%c0_37, %c0_38, %c0_39] : memref<1x8x32xbf16, #tpu.memory_space<vmem>>, vector<1x8x32xbf16>
    %99 = vector.shape_cast %98 : vector<1x8x32xbf16> to vector<8x32xbf16>
    %100 = vector.shape_cast %97 : vector<8x32xbf16> to vector<1x8x32xbf16>
    tpu.vector_store %arg4[%c0_37, %c0_38, %c0_39], %100 {strides = array<i32>} : memref<1x8x32xbf16, #tpu.memory_space<vmem>>, vector<1x8x32xbf16>,
    return
  }
  func.func @transform_0(%arg0: i32) -> (i32, i32, i32) {
    %c0_i32 = arith.constant 0 : i32
    %c0_i32_0 = arith.constant 0 : i32
    %c0_i32_1 = arith.constant 0 : i32
    return %arg0, %c0_i32, %c0_i32_0 : i32, i32, i32
  }
  func.func @transform_1(%arg0: i32) -> (i32, i32, i32) {
    %c0_i32 = arith.constant 0 : i32
    %c0_i32_0 = arith.constant 0 : i32
    %c0_i32_1 = arith.constant 0 : i32
    %c0_i32_2 = arith.constant 0 : i32
    return %c0_i32, %c0_i32_0, %c0_i32_1 : i32, i32, i32
  }
  func.func @transform_2(%arg0: i32) -> (i32, i32, i32) {
    %c0_i32 = arith.constant 0 : i32
    %c0_i32_0 = arith.constant 0 : i32
    %c0_i32_1 = arith.constant 0 : i32
    %c0_i32_2 = arith.constant 0 : i32
    return %c0_i32, %c0_i32_0, %c0_i32_1 : i32, i32, i32
  }
  func.func @transform_3(%arg0: i32) -> (i32, i32, i32) {
    %c0_i32 = arith.constant 0 : i32
    %c0_i32_0 = arith.constant 0 : i32
    %c0_i32_1 = arith.constant 0 : i32
    return %arg0, %c0_i32, %c0_i32_0 : i32, i32, i32
  }
}

module attributes {stable_mosaic.version = 11 : i64} {
  func.func @_ffn_res_ln_kernel(%arg0: i32, %arg1: memref<8x32xbf16, #tpu.memory_space<vmem>>, %arg2: memref<32x64xbf16, #tpu.memory_space<vmem>>, %arg3: memref<1x64xf32, #tpu.memory_space<vmem>>, %arg4: memref<64x32xbf16, #tpu.memory_space<vmem>>, %arg5: memref<1x32xf32, #tpu.memory_space<vmem>>, %arg6: memref<1x32xf32, #tpu.memory_space<vmem>>, %arg7: memref<1x32xf32, #tpu.memory_space<vmem>>, %arg8: memref<8x32xf32, #tpu.memory_space<vmem>>) attributes {dimension_semantics = [#tpu.dimension_semantics<parallel>], iteration_bounds = array<i64: 2>, scalar_prefetch = 0 : i64, scratch_operands = 0 : i64, tpu.core_type = #tpu.core_type<tc>, window_params = [{transform_indices = @transform_0, window_bounds = array<i64: 8, 32>}, {pipeline_mode = #tpu.pipeline_mode<synchronous>, transform_indices = @transform_1, window_bounds = array<i64: 32, 64>}, {pipeline_mode = #tpu.pipeline_mode<synchronous>, transform_indices = @transform_2, window_bounds = array<i64: 1, 64>}, {pipeline_mode = #tpu.pipeline_mode<synchronous>, transform_indices = @transform_3, window_bounds = array<i64: 64, 32>}, {pipeline_mode = #tpu.pipeline_mode<synchronous>, transform_indices = @transform_4, window_bounds = array<i64: 1, 32>}, {pipeline_mode = #tpu.pipeline_mode<synchronous>, transform_indices = @transform_5, window_bounds = array<i64: 1, 32>}, {pipeline_mode = #tpu.pipeline_mode<synchronous>, transform_indices = @transform_6, window_bounds = array<i64: 1, 32>}, {transform_indices = @transform_7, window_bounds = array<i64: 8, 32>}]} {
    %c0 = arith.constant 0 : index
    %c0_0 = arith.constant 0 : index
    %0 = vector.load %arg1[%c0, %c0_0] : memref<8x32xbf16, #tpu.memory_space<vmem>>, vector<8x32xbf16>
    %c0_1 = arith.constant 0 : index
    %c0_2 = arith.constant 0 : index
    %1 = vector.load %arg2[%c0_1, %c0_2] : memref<32x64xbf16, #tpu.memory_space<vmem>>, vector<32x64xbf16>
    %cst = arith.constant dense<0.000000e+00> : vector<8x64xf32>
    %2 = tpu.matmul %0, %1, %cst {dimension_numbers = #tpu.dot_dimension_numbers<[1], [0], [0], [1], [0, 0, 1, 1], [], []>} : vector<8x32xbf16>, vector<32x64xbf16>, vector<8x64xf32> -> vector<8x64xf32>
    %c0_3 = arith.constant 0 : index
    %c0_4 = arith.constant 0 : index
    %3 = vector.load %arg3[%c0_3, %c0_4] : memref<1x64xf32, #tpu.memory_space<vmem>>, vector<1x64xf32>
    %4 = vector.broadcast %3 : vector<1x64xf32> to vector<8x64xf32>
    %5 = arith.addf %2, %4 : vector<8x64xf32>
    %cst_5 = arith.constant 0.000000e+00 : f32
    %6 = vector.broadcast %cst_5 : f32 to vector<8x64xf32>
    %7 = arith.maximumf %5, %6 : vector<8x64xf32>
    %8 = arith.truncf %7 : vector<8x64xf32> to vector<8x64xbf16>
    %c0_6 = arith.constant 0 : index
    %c0_7 = arith.constant 0 : index
    %9 = vector.load %arg4[%c0_6, %c0_7] : memref<64x32xbf16, #tpu.memory_space<vmem>>, vector<64x32xbf16>
    %cst_8 = arith.constant dense<0.000000e+00> : vector<8x32xf32>
    %10 = tpu.matmul %8, %9, %cst_8 {dimension_numbers = #tpu.dot_dimension_numbers<[1], [0], [0], [1], [0, 0, 1, 1], [], []>} : vector<8x64xbf16>, vector<64x32xbf16>, vector<8x32xf32> -> vector<8x32xf32>
    %c0_9 = arith.constant 0 : index
    %c0_10 = arith.constant 0 : index
    %11 = vector.load %arg5[%c0_9, %c0_10] : memref<1x32xf32, #tpu.memory_space<vmem>>, vector<1x32xf32>
    %12 = vector.broadcast %11 : vector<1x32xf32> to vector<8x32xf32>
    %13 = arith.addf %10, %12 : vector<8x32xf32>
    %14 = arith.extf %0 : vector<8x32xbf16> to vector<8x32xf32>
    %15 = arith.addf %14, %13 : vector<8x32xf32>
    %cst_11 = arith.constant dense<0.000000e+00> : vector<8xf32>
    %16 = vector.multi_reduction <add>, %15, %cst_11 [1] : vector<8x32xf32> to vector<8xf32>
    %17 = vector.shape_cast %16 : vector<8xf32> to vector<8x1xf32>
    %cst_12 = arith.constant 3.200000e+01 : f32
    %18 = vector.broadcast %cst_12 : f32 to vector<8x1xf32>
    %19 = arith.divf %17, %18 : vector<8x1xf32>
    %20 = vector.broadcast %19 : vector<8x1xf32> to vector<8x32xf32>
    %21 = arith.subf %15, %20 : vector<8x32xf32>
    %22 = arith.mulf %21, %21 : vector<8x32xf32>
    %cst_13 = arith.constant dense<0.000000e+00> : vector<8xf32>
    %23 = vector.multi_reduction <add>, %22, %cst_13 [1] : vector<8x32xf32> to vector<8xf32>
    %24 = vector.shape_cast %23 : vector<8xf32> to vector<8x1xf32>
    %cst_14 = arith.constant 3.200000e+01 : f32
    %25 = vector.broadcast %cst_14 : f32 to vector<8x1xf32>
    %26 = arith.divf %24, %25 : vector<8x1xf32>
    %cst_15 = arith.constant 9.99999974E-6 : f32
    %27 = vector.broadcast %cst_15 : f32 to vector<8x1xf32>
    %28 = arith.addf %26, %27 : vector<8x1xf32>
    %29 = math.rsqrt %28 : vector<8x1xf32>
    %30 = vector.broadcast %29 : vector<8x1xf32> to vector<8x32xf32>
    %31 = arith.mulf %21, %30 : vector<8x32xf32>
    %c0_16 = arith.constant 0 : index
    %c0_17 = arith.constant 0 : index
    %32 = vector.load %arg6[%c0_16, %c0_17] : memref<1x32xf32, #tpu.memory_space<vmem>>, vector<1x32xf32>
    %33 = vector.broadcast %32 : vector<1x32xf32> to vector<8x32xf32>
    %34 = arith.mulf %31, %33 : vector<8x32xf32>
    %c0_18 = arith.constant 0 : index
    %c0_19 = arith.constant 0 : index
    %35 = vector.load %arg7[%c0_18, %c0_19] : memref<1x32xf32, #tpu.memory_space<vmem>>, vector<1x32xf32>
    %36 = vector.broadcast %35 : vector<1x32xf32> to vector<8x32xf32>
    %37 = arith.addf %34, %36 : vector<8x32xf32>
    %c0_20 = arith.constant 0 : index
    %c0_21 = arith.constant 0 : index
    %38 = vector.load %arg8[%c0_20, %c0_21] : memref<8x32xf32, #tpu.memory_space<vmem>>, vector<8x32xf32>
    tpu.vector_store %arg8[%c0_20, %c0_21], %37 {strides = array<i32>} : memref<8x32xf32, #tpu.memory_space<vmem>>, vector<8x32xf32>,
    return
  }
  func.func @transform_0(%arg0: i32) -> (i32, i32) {
    %c0_i32 = arith.constant 0 : i32
    %c0_i32_0 = arith.constant 0 : i32
    return %arg0, %c0_i32 : i32, i32
  }
  func.func @transform_1(%arg0: i32) -> (i32, i32) {
    %c0_i32 = arith.constant 0 : i32
    %c0_i32_0 = arith.constant 0 : i32
    %c0_i32_1 = arith.constant 0 : i32
    return %c0_i32, %c0_i32_0 : i32, i32
  }
  func.func @transform_2(%arg0: i32) -> (i32, i32) {
    %c0_i32 = arith.constant 0 : i32
    %c0_i32_0 = arith.constant 0 : i32
    %c0_i32_1 = arith.constant 0 : i32
    return %c0_i32, %c0_i32_0 : i32, i32
  }
  func.func @transform_3(%arg0: i32) -> (i32, i32) {
    %c0_i32 = arith.constant 0 : i32
    %c0_i32_0 = arith.constant 0 : i32
    %c0_i32_1 = arith.constant 0 : i32
    return %c0_i32, %c0_i32_0 : i32, i32
  }
  func.func @transform_4(%arg0: i32) -> (i32, i32) {
    %c0_i32 = arith.constant 0 : i32
    %c0_i32_0 = arith.constant 0 : i32
    %c0_i32_1 = arith.constant 0 : i32
    return %c0_i32, %c0_i32_0 : i32, i32
  }
  func.func @transform_5(%arg0: i32) -> (i32, i32) {
    %c0_i32 = arith.constant 0 : i32
    %c0_i32_0 = arith.constant 0 : i32
    %c0_i32_1 = arith.constant 0 : i32
    return %c0_i32, %c0_i32_0 : i32, i32
  }
  func.func @transform_6(%arg0: i32) -> (i32, i32) {
    %c0_i32 = arith.constant 0 : i32
    %c0_i32_0 = arith.constant 0 : i32
    %c0_i32_1 = arith.constant 0 : i32
    return %c0_i32, %c0_i32_0 : i32, i32
  }
  func.func @transform_7(%arg0: i32) -> (i32, i32) {
    %c0_i32 = arith.constant 0 : i32
    %c0_i32_0 = arith.constant 0 : i32
    return %arg0, %c0_i32 : i32, i32
  }
}

</mosaic_0001>

<bundles_post_ra>
// kernel: transformer_encoder_layer.4
= control target key start
LH: loop header
LB: loop body
LE: loop exit
PB: predicated region body
PF: predicated region fallthrough
CT: control target
= control target key end

     0   :  { %11 = vsyncpa [#allocation3], 0  ;;  %s778_s0 = inlined_call_operand.vmem [shape: bf16[16,32], index: 0, kind: input, shape index: {}]   ;;  %s779_s1 = inlined_call_operand.vmem [shape: f32[16,32], index: 1, kind: input, shape index: {}]   ;;  %s780_s2 = inlined_call_operand.hbm [shape: bf16[32,32], index: 2, kind: input, shape index: {}]   ;;  %s781_s3 = inlined_call_operand.vmem [shape: f32[1,32], index: 3, kind: input, shape index: {}]   ;;  %s782_s4 = inlined_call_operand.hbm [shape: f32[1,32], index: 4, kind: input, shape index: {}]   ;;  %s783_s5 = inlined_call_operand.hbm [shape: f32[1,32], index: 5, kind: input, shape index: {}]   ;;  %s784_s6 = inlined_call_operand.vmem [shape: bf16[16,32], index: 6, kind: output, shape index: {}]  }
   0x1   :  { %12 = vsyncpa [#allocation5], 0  ;;  %s712_s21 = smov 0  }
   0x2 LB: > { %s214_s24 = sshll.u32 %s782_s4, 4  ;;  %s721_s25 = sadd.s32 4294967295, %s669_s21   ;;  %s669_s21 = sphi %s712_s21, %s18_s21   ;;  %s215_s24 = int_to_ptr.hbm [resolvable:$true] %s214_s24 }
   0x3   : > { %p491_p0 = scmp.ge.s32.totalorder %s669_s21, 1  ;;  %p185_p1 = scmp.lt.s32.totalorder %s669_s21, 3 }
   0x4   : > { %p538_p2 = scmp.eq.s32.totalorder %s721_s25, 0  ;;  %s671_s27 = smov [#allocation4]  }
   0x5   : > { %p726_p3 = pnand %p491_p0, %p185_p1  ;;  %s216_s28 = sshll.u32 %s671_s27, 4  ;;  %s217_s28 = int_to_ptr.vmem [resolvable:$true] %s216_s28 }
   0x6   : > { %s196_s7 = sshll.u32 %s780_s2, 4  ;;  %s672_s8 = smov [#allocation2]   ;;  %s197_s7 = int_to_ptr.hbm [resolvable:$true] %s196_s7 }
   0x7   : > { %p528_p4 = pneg %p726_p3  ;;  %s198_s9 = sshll.u32 %s672_s8, 4  ;;  %s199_s9 = int_to_ptr.vmem [resolvable:$true] %s198_s9 }
   0x8   : > { %s226_s12 = sshll.u32 %s783_s5, 4  ;;  %s673_s13 = smov 64   ;;  %s227_s12 = int_to_ptr.hbm [resolvable:$true] %s226_s12 }
   0x9   : > { %p529_p5 = pnand %p538_p2, %p528_p4  ;;  %s674_s14 = smov 4  }
   0xa   : > { %s675_s15 = smov [#allocation6]   ;;  %255 = sbr.rel (%p726_p3) target bundleno = 427 (0x1ab), region = 44 }
   0xb   : > { %534 = dma.hbm_to_vmem [thread:$0]  (!%p529_p5), %s215_s24, 16, %s217_s28, [#allocation5]  }
   0xc   : > { %531 = dma.hbm_to_vmem [thread:$0]  (!%p529_p5), %s197_s7, 256, %s199_s9, [#allocation3], %s673_s13, %s673_s13, %s674_s14  }
   0xd   : > { %s228_s16 = sshll.u32 %s675_s15, 4  ;;  %s229_s16 = int_to_ptr.vmem [resolvable:$true] %s228_s16 }
   0xe   : > { %537 = dma.hbm_to_vmem [thread:$0]  (!%p529_p5), %s227_s12, 16, %s229_s16, [#allocation5]  }
   0xf   : > { %660 = dma.done.wait (%p538_p2), [#allocation3], 256  }
  0x10   : > { %662 = vsyncadd (%p538_p2), [#allocation3], 4294967040 }
  0x11   : > { %664 = dma.done.wait (%p538_p2), [#allocation5], 32  }
  0x12   : > { %666 = vsyncadd (%p538_p2), [#allocation5], 4294967264  ;;  %p298_p6 = scmp.lt.s32.totalorder %s721_s25, 1  ;;  %v515_v0 = vld [vmem:[#allocation2 + $0x8] sm:$0xff]  ;;  %v514_v1 = vld [vmem:[#allocation2] sm:$0xff]  ;;  %vm332_vm0 = vcmask 261120  }
  0x13   : > { %342 = vmatpush.bf16.msra.mxu0 %v515_v0  ;;  %v558_v3 = vld [vmem:[%s781_s3] ss:$0 sm:$0xff]  ;;  %v676_v10 = vmov 32.0   ;;  %v559_v31 = vld [vmem:[#allocation4] ss:$0 sm:$0xff]  ;;  %vm391_vm5 = vcmask 257024  }
  0x14   : > { %s787_s25 = smov (!%p298_p6, %s721_s25), 1  ;;  %561 = vrcp.f32 %v676_v10  ;;  %v560_v33 = vld [vmem:[#allocation6] ss:$0 sm:$0xff] }
  0x15   : > { %s500_s17 = sshll.u32 %s787_s25, 2  ;;  %s501_s22 = sshll.u32 %s787_s25, 3 }
  0x16   : > { %s301_s20 = scalar_lea.vmem %s778_s0, %s500_s17  ;;  %s305_s28 = scalar_lea.vmem %s779_s1, %s501_s22 }
  0x17   : > { %343 = vmatpush.bf16.msra.mxu0 %v514_v1  ;;  %v311_v2 = vld [vmem:[%s301_s20] sm:$0xf]  ;;  %s309_s7 = scalar_lea.vmem %s784_s6, %s500_s17 }
  0x18   : > { %v349_v5 = vld [vmem:[%s305_s28] sm:$0xff] }
  0x1a   : > { %511 = vmatmul.msk.bf16.vlgmr.msra.gmra.mxu0 %vm332_vm0, %v311_v2  ;;  %v562_v11 = vpop.eup %561 }
  0x1b   : > { %v355_v12 = vmul.f32 32.0, %v562_v11  ;;  %vm359_vm1 = vweird.f32 %v562_v11 }
  0x1d   : > { %v356_v13 = vsub.f32 1.0, %v355_v12 }
  0x1f   : > { %v357_v14 = vmul.f32 %v562_v11, %v356_v13 }
  0x21   : > { %v358_v15 = vadd.f32 %v562_v11, %v357_v14 }
  0x23   : > { %v360_v16 = vsel %vm359_vm1, %v562_v11, %v358_v15 }
  0x97   : > { %v345_v4 = vpop.f32.mrf.mxu0 }
  0x98   : > { %v346_v6 = vadd.f32 %v558_v3, %v345_v4 }
  0x9a   : > { %v350_v7 = vadd.f32 %v349_v5, %v346_v6 }
  0x9c   : > { %v351_v8 = vsel %vm332_vm0, %v350_v7, 0.0 }
  0x9d   : > { %352 = vadd.xlane.f32.xlu0 %v351_v8 }
  0x9f   : > { %v347_v9 = vpop.f32.mrf.mxu0 }
 0x110   : > { %v353_v17 = vpop.xlane.xlu0 %352 }
 0x111   : > { %v361_v18 = vmul.f32 %v360_v16, %v353_v17 }
 0x113   : > { %v362_v19 = vsub.f32 %v350_v7, %v361_v18 }
 0x115   : > { %v363_v20 = vmul.f32 %v362_v19, %v362_v19 }
 0x117   : > { %v364_v21 = vsel %vm332_vm0, %v363_v20, 0.0 }
 0x118   : > { %365 = vadd.xlane.f32.xlu0 %v364_v21 }
 0x18b   : > { %v366_v22 = vpop.xlane.xlu0 %365 }
 0x18c   : > { %v367_v23 = vmul.f32 %v366_v22, %v360_v16 }
 0x18e   : > { %v368_v24 = vadd.f32 1e-05, %v367_v23 }
 0x190   : > { %563 = vrsqrt.f32 %v368_v24  ;;  %vm375_vm3 = vweird.f32 %v368_v24 }
 0x196   : > { %v564_v25 = vpop.eup %563 }
 0x197   : > { %v370_v26 = vmul.f32 %v564_v25, %v368_v24  ;;  %vm376_vm2 = vweird.f32 %v564_v25 }
 0x198   : > { %vm377_vm4 = vmor %vm375_vm3, %vm376_vm2 }
 0x199   : > { %v371_v27 = vmul.f32 %v564_v25, %v370_v26 }
 0x19b   : > { %v372_v28 = vmul.f32 0.5, %v371_v27 }
 0x19d   : > { %v373_v29 = vsub.f32 1.5, %v372_v28 }
 0x19f   : > { %v374_v30 = vmul.f32 %v564_v25, %v373_v29 }
 0x1a1   : > { %v378_v32 = vsel %vm377_vm4, %v564_v25, %v374_v30 }
 0x1a2   : > { %v379_v34 = vmul.f32 %v378_v32, %v362_v19 }
 0x1a4   : > { %v384_v35 = vmul.f32 %v559_v31, %v379_v34 }
 0x1a6   : > { %v389_v36 = vadd.f32 %v560_v33, %v384_v35 }
 0x1a8   : > { %v390_v37 = vpack.c.bf16 %v389_v36, %v389_v36 }
 0x1aa   : > { %392 = vst.msk [vmem:[%s309_s7] sm:$0xf] %vm391_vm5, %v390_v37 }
 0x1ab PF: > { %s18_s21 = sadd.s32 1, %s669_s21  }
 0x1ac   : > { %p15_p7 = scmp.ge.s32.totalorder %s18_s21, 4  }
 0x1ae   :  { %17 = sbr.rel (!%p15_p7) target bundleno = 2 (0x2), region = 90 }
 0x1b3   :  { %412 = vsyncpa [#allocation3], 1 }
 0x1b4   :  { %414 = vsyncpa [#allocation3 + $0x1], 1 }
 0x1b5   :  { %415 = vsyncpa [#allocation5], 1 }

// kernel: transformer_encoder_layer.3
= control target key start
LH: loop header
LB: loop body
LE: loop exit
PB: predicated region body
PF: predicated region fallthrough
CT: control target
= control target key end

     0   :  { %8 = vsyncpa [#allocation3], 0  ;;  %s799_s12 = smov 0   ;;  %s878_s0 = inlined_call_operand.vmem [shape: f32[2,8,32], index: 0, kind: input, shape index: {}]   ;;  %s879_s1 = inlined_call_operand.vmem [shape: bf16[3,32,32], index: 1, kind: input, shape index: {}]   ;;  %s880_s2 = inlined_call_operand.hbm [shape: f32[3,1,32], index: 2, kind: input, shape index: {}]   ;;  %s881_s3 = inlined_call_operand.vmem [shape: bf16[2,8,32], index: 3, kind: output, shape index: {}]  }
   0x1 LB: > { %s127_s15 = sshll.u32 %s880_s2, 4  ;;  %s622_s16 = sadd.s32 4294967295, %s768_s12   ;;  %s768_s12 = sphi %s799_s12, %s14_s12   ;;  %s128_s15 = int_to_ptr.hbm [resolvable:$true] %s127_s15 }
   0x2   : > { %p624_p0 = scmp.ge.s32.totalorder %s768_s12, 1  ;;  %p113_p1 = scmp.lt.s32.totalorder %s768_s12, 3 }
   0x3   : > { %p690_p2 = scmp.eq.s32.totalorder %s622_s16, 0  ;;  %s770_s17 = smov [#allocation2]  }
   0x4   : > { %p114_p3 = pnand %p624_p0, %p113_p1  ;;  %s129_s18 = sshll.u32 %s770_s17, 4  ;;  %s130_s18 = int_to_ptr.vmem [resolvable:$true] %s129_s18 }
   0x5   : > { %s771_s19 = smov 16   ;;  %s772_s20 = smov 1  }
   0x6   : > { %p686_p4 = pneg %p114_p3  ;;  %152 = sbr.rel (%p114_p3) target bundleno = 950 (0x3b6), region = 32 }
   0x8   : > { %p687_p5 = pnand %p690_p2, %p686_p4 }
   0xa   : > { %689 = dma.hbm_to_vmem [thread:$0]  (!%p687_p5), %s128_s15, 48, %s130_s18, [#allocation3], %s771_s19, %s771_s19, %s772_s20  }
   0xb   : > { %763 = dma.done.wait (%p690_p2), [#allocation3], 48  }
   0xc   : > { %765 = vsyncadd (%p690_p2), [#allocation3], 4294967248  ;;  %p175_p6 = scmp.lt.s32.totalorder %s622_s16, 1  ;;  %v677_v0 = vld [vmem:[%s879_s1 + $0x8] sm:$0xff]  ;;  %v679_v1 = vld [vmem:[%s879_s1 + $0x18] sm:$0xff]  ;;  %vm206_vm0 = vcmask 261120  }
   0xd   : > { %v676_v2 = vld [vmem:[%s879_s1] sm:$0xff]  ;;  %v678_v3 = vld [vmem:[%s879_s1 + $0x10] sm:$0xff]  ;;  %216 = vmatpush.bf16.msra.mxu0 %v677_v0  ;;  %252 = vmatpush.bf16.msra.mxu1 %v679_v1  ;;  %vm297_vm1 = vcmask 64512   ;;  %s773_s6 = smov 112   ;;  %s774_s7 = smov 120   ;;  %v681_v22 = vld [vmem:[%s879_s1 + $0x28] sm:$0xff] }
   0xe   : > { %s883_s16 = smov (!%p175_p6, %s622_s16), 1  ;;  %v709_v6 = vld [vmem:[#allocation2] ss:$0 sm:$0xff]  ;;  %v710_v7 = vld [vmem:[#allocation2 + $0x1] ss:$0 sm:$0xff]  ;;  %s775_s8 = smov 104   ;;  %287 = vmatpush.bf16.msra.mxu2 %v681_v22 }
   0xf   : > { %s629_s21 = sshll.u32 %s883_s16, 3  ;;  %v680_v35 = vld [vmem:[%s879_s1 + $0x20] sm:$0xff]  ;;  %vm332_vm2 = vcmask 1043456   ;;  %s776_s14 = smov 8   ;;  %vm548_vm3 = vcmask 130048   ;;  %vm551_vm4 = vcmask 195584  }
  0x10   : > { %s178_s24 = scalar_lea.vmem %s878_s0, %s629_s21  ;;  %v711_v50 = vld [vmem:[#allocation2 + $0x2] ss:$0 sm:$0xff]  ;;  %s777_s15 = smov 24   ;;  %vm555_vm5 = vcmask 257024  }
  0x11   : > { %v184_v4 = vld [vmem:[%s178_s24] sm:$0xff]  ;;  %217 = vmatpush.bf16.msra.mxu0 %v676_v2  ;;  %253 = vmatpush.bf16.msra.mxu1 %v678_v3  ;;  %s778_s17 = smov 16   ;;  %s630_s18 = sshll.u32 %s883_s16, 2 }
  0x12   : > { %v185_v5 = vpack.c.bf16 %v184_v4, %v184_v4  ;;  %288 = vmatpush.bf16.msra.mxu2 %v680_v35  ;;  %s182_s21 = scalar_lea.vmem %s881_s3, %s630_s18 }
  0x14   : > { %639 = vmatmul.msk.bf16.vlgmr.msra.gmra.mxu0 %vm206_vm0, %v185_v5  ;;  %652 = vmatmul.msk.bf16.vlgmr.msra.gmra.mxu1 %vm206_vm0, %v185_v5 }
  0x15   : > { %665 = vmatmul.msk.bf16.vlgmr.msra.gmra.mxu2 %vm206_vm0, %v185_v5 }
  0x91   : > { %v219_v8 = vpop.f32.mrf.mxu0  ;;  %v255_v9 = vpop.f32.mrf.mxu1 }
  0x92   : > { %v220_v10 = vadd.f32 %v709_v6, %v219_v8  ;;  %v256_v11 = vadd.f32 %v710_v7, %v255_v9 }
  0x94   : > { %v223_v12 = vmul.f32 0.35355338, %v220_v10  ;;  %v295_v13 = vpack.c.bf16 %v256_v11, %v256_v11 }
  0x96   : > { %v294_v14 = vpack.c.bf16 %v223_v12, %v223_v12  ;;  %v356_v15 = vunpack.c.l.b16 %v295_v13  ;;  %v302_v16 = vsel %vm297_vm1, %v295_v13, 0 }
  0x97   : > { %311 = vmatpush.bf16.xpose.msra.mxu3 %v302_v16 }
  0x98   : > { %v351_v17 = vunpack.c.l.b16 %v294_v14  ;;  %v357_v18 = vpack.c.b16 %v356_v15, %v356_v15  ;;  %v290_v51 = vpop.f32.mrf.mxu2 }
  0x99   : > { %v221_v19 = vpop.f32.mrf.mxu0  ;;  %v257_v20 = vpop.f32.mrf.mxu1  ;;  %v291_v52 = vadd.f32 %v711_v50, %v290_v51 }
  0x9a   : > { %418 = vrot.lane.b32.xlu1 %v357_v18, %s773_s6  ;;  %358 = vrot.lane.b32.xlu0 %v357_v18, %s774_s7  ;;  %v352_v21 = vpack.c.b16 %v351_v17, %v351_v17 }
  0x9b   : > { %v296_v53 = vpack.c.bf16 %v291_v52, %v291_v52 }
  0x9c   : > { %416 = vrot.lane.b32.xlu2 %v352_v21, %s773_s6 }
  0x9d   : > { %v392_v54 = vunpack.c.l.b16 %v296_v53  ;;  %v334_v55 = vsel %vm332_vm2, %v296_v53, 0 }
  0x9e   : > { %666 = vmatmul.msk.bf16.vlgmr.msra.gmra.mxu3 %vm297_vm1, %v294_v14  ;;  %343 = vmatpush.bf16.msrb.mxu0 %v334_v55 }
  0x9f   : > { %v393_v56 = vpack.c.b16 %v392_v54, %v392_v54 }
  0xa0   : > { %v292_v57 = vpop.f32.mrf.mxu2 }
  0xa2   : > { %475 = vrot.lane.b32.xlu1 %v357_v18, %s775_s8  ;;  %353 = vrot.lane.b32.xlu0 %v352_v21, %s774_s7 }
  0xa4   : > { %473 = vrot.lane.b32.xlu2 %v352_v21, %s775_s8 }
  0xf6   : > { %v417_v27 = vpop.permute.xlu2 %416 }
  0xfe   : > { %v474_v33 = vpop.permute.xlu2 %473 }
 0x10c   : > { %v419_v23 = vpop.permute.xlu1 %418  ;;  %v359_v24 = vpop.permute.xlu0 %358 }
 0x10d   : > { %v364_v25 = vsel %vm297_vm1, %v359_v24, 0  ;;  %v424_v26 = vsel %vm297_vm1, %v419_v23, 0 }
 0x10e   : > { %373 = vmatpush.bf16.xpose.msrb.mxu1 %v364_v25  ;;  %433 = vmatpush.bf16.xpose.msrb.mxu3 %v424_v26 }
 0x114   : > { %v476_v28 = vpop.permute.xlu1 %475  ;;  %v354_v29 = vpop.permute.xlu0 %353 }
 0x115   : > { %v481_v30 = vsel %vm297_vm1, %v476_v28, 0  ;;  %668 = vmatmul.msk.bf16.vlgmr.msrb.gmra.mxu1 %vm297_vm1, %v354_v29  ;;  %670 = vmatmul.msk.bf16.vlgmr.msrb.gmra.mxu3 %vm297_vm1, %v417_v27 }
 0x116   : > { %490 = vmatpush.bf16.xpose.msra.mxu1 %v481_v30 }
 0x121   : > { %v313_v31 = vpop.f32.mrf.mxu3 }
 0x122   : > { %v317_v32 = vsel %vm297_vm1, %v313_v31, -inf }
 0x123   : > { %318 = vmax.xlane.f32.xlu1 %v317_v32 }
 0x125   : > { %672 = vmatmul.msk.bf16.vlgmr.msra.gmra.mxu1 %vm297_vm1, %v474_v33 }
 0x129   : > { %v315_v34 = vpop.f32.mrf.mxu3 }
 0x192   : > { %v375_v36 = vpop.f32.mrf.mxu1 }
 0x193   : > { %v379_v37 = vsel %vm297_vm1, %v375_v36, -inf }
 0x194   : > { %380 = vmax.xlane.f32.xlu0 %v379_v37 }
 0x196   : > { %v319_v38 = vpop.xlane.xlu1 %318 }
 0x197   : > { %v320_v39 = vsub.f32 %v313_v31, %v319_v38 }
 0x198   : > { %v435_v40 = vpop.f32.mrf.mxu3 }
 0x199   : > { %v321_v41 = vmul.f32 1.442695, %v320_v39  ;;  %v439_v49 = vsel %vm297_vm1, %v435_v40, -inf }
 0x19a   : > { %v377_v42 = vpop.f32.mrf.mxu1 }
 0x19b   : > { %712 = vpow2.f32 %v321_v41 }
 0x1a0   : > { %v437_v43 = vpop.f32.mrf.mxu3 }
 0x1a1   : > { %v713_v44 = vpop.eup %712 }
 0x1a2   : > { %v492_v45 = vpop.f32.mrf.mxu1  ;;  %v323_v46 = vsel %vm297_vm1, %v713_v44, 0.0 }
 0x1a3   : > { %324 = vadd.xlane.f32.xlu1 %v323_v46  ;;  %v496_v47 = vsel %vm297_vm1, %v492_v45, -inf }
 0x1a4   : > { %497 = vmax.xlane.f32.xlu2 %v496_v47 }
 0x1aa   : > { %v494_v48 = vpop.f32.mrf.mxu1 }
 0x1ac   : > { %440 = vmax.xlane.f32.xlu2 %v439_v49 }
 0x1c4   : > { %394 = vrot.lane.b32.xlu2 %v393_v56, %s774_s7 }
 0x207   : > { %v381_v58 = vpop.xlane.xlu0 %380 }
 0x208   : > { %v382_v59 = vsub.f32 %v375_v36, %v381_v58 }
 0x20a   : > { %v383_v60 = vmul.f32 1.442695, %v382_v59 }
 0x20c   : > { %714 = vpow2.f32 %v383_v60 }
 0x212   : > { %v715_v61 = vpop.eup %714 }
 0x213   : > { %v385_v62 = vsel %vm297_vm1, %v715_v61, 0.0 }
 0x214   : > { %386 = vadd.xlane.f32.xlu0 %v385_v62 }
 0x216   : > { %v325_v63 = vpop.xlane.xlu1 %324 }
 0x217   : > { %716 = vrcp.f32 %v325_v63  ;;  %v498_v0 = vpop.xlane.xlu2 %497 }
 0x218   : > { %v499_v1 = vsub.f32 %v492_v45, %v498_v0 }
 0x21a   : > { %v500_v2 = vmul.f32 1.442695, %v499_v1 }
 0x21c   : > { %718 = vpow2.f32 %v500_v2 }
 0x21d   : > { %v717_v3 = vpop.eup %716 }
 0x21e   : > { %v327_v4 = vmul.f32 %v717_v3, %v713_v44 }
 0x21f   : > { %v441_v5 = vpop.xlane.xlu2 %440 }
 0x220   : > { %v442_v6 = vsub.f32 %v435_v40, %v441_v5  ;;  %v328_v7 = vpack.c.bf16 %v327_v4, %v327_v4 }
 0x222   : > { %v719_v8 = vpop.eup %718  ;;  %v443_v9 = vmul.f32 1.442695, %v442_v6  ;;  %667 = vmatmul.msk.bf16.vlgmr.msrb.gmra.mxu0 %vm297_vm1, %v328_v7 }
 0x223   : > { %v502_v10 = vsel %vm297_vm1, %v719_v8, 0.0 }
 0x224   : > { %720 = vpow2.f32 %v443_v9  ;;  %503 = vadd.xlane.f32.xlu0 %v502_v10 }
 0x227   : > { %v395_v13 = vpop.permute.xlu2 %394 }
 0x228   : > { %v400_v14 = vsel %vm332_vm2, %v395_v13, 0 }
 0x229   : > { %409 = vmatpush.bf16.msrb.mxu2 %v400_v14 }
 0x22a   : > { %v721_v11 = vpop.eup %720 }
 0x22b   : > { %v445_v12 = vsel %vm297_vm1, %v721_v11, 0.0 }
 0x22c   : > { %446 = vadd.xlane.f32.xlu1 %v445_v12 }
 0x238   : > { %508 = vrot.lane.b32.xlu0 %v393_v56, %s775_s8 }
 0x245   : > { %451 = vrot.lane.b32.xlu1 %v393_v56, %s773_s6 }
 0x287   : > { %v387_v15 = vpop.xlane.xlu0 %386 }
 0x288   : > { %722 = vrcp.f32 %v387_v15 }
 0x28e   : > { %v723_v16 = vpop.eup %722 }
 0x28f   : > { %v389_v17 = vmul.f32 %v723_v16, %v715_v61 }
 0x291   : > { %v390_v18 = vpack.c.bf16 %v389_v17, %v389_v17 }
 0x293   : > { %669 = vmatmul.msk.bf16.vlgmr.msrb.gmra.mxu2 %vm297_vm1, %v390_v18 }
 0x297   : > { %v504_v19 = vpop.xlane.xlu0 %503 }
 0x298   : > { %724 = vrcp.f32 %v504_v19 }
 0x29e   : > { %v725_v21 = vpop.eup %724 }
 0x29f   : > { %v345_v20 = vpop.f32.mrf.mxu0  ;;  %v506_v23 = vmul.f32 %v725_v21, %v719_v8  ;;  %v447_v24 = vpop.xlane.xlu1 %446 }
 0x2a0   : > { %726 = vrcp.f32 %v447_v24  ;;  %v349_v49 = vpack.c.bf16 %v345_v20, %v345_v20 }
 0x2a1   : > { %v507_v27 = vpack.c.bf16 %v506_v23, %v506_v23 }
 0x2a6   : > { %v727_v28 = vpop.eup %726 }
 0x2a7   : > { %v347_v22 = vpop.f32.mrf.mxu0  ;;  %v449_v29 = vmul.f32 %v727_v28, %v721_v11 }
 0x2a9   : > { %v450_v32 = vpack.c.bf16 %v449_v29, %v449_v29 }
 0x2aa   : > { %v509_v25 = vpop.permute.xlu0 %508 }
 0x2ab   : > { %v514_v26 = vsel %vm332_vm2, %v509_v25, 0 }
 0x2ac   : > { %523 = vmatpush.bf16.msra.mxu2 %v514_v26 }
 0x2af   : > { %673 = vmatmul.msk.bf16.vlgmr.msra.gmra.mxu2 %vm297_vm1, %v507_v27 }
 0x2b7   : > { %v452_v30 = vpop.permute.xlu1 %451 }
 0x2b8   : > { %v457_v31 = vsel %vm332_vm2, %v452_v30, 0 }
 0x2b9   : > { %466 = vmatpush.bf16.msra.mxu0 %v457_v31 }
 0x2bc   : > { %671 = vmatmul.msk.bf16.vlgmr.msra.gmra.mxu0 %vm297_vm1, %v450_v32 }
 0x316   : > { %v411_v33 = vpop.f32.mrf.mxu2 }
 0x317   : > { %v415_v34 = vpack.c.bf16 %v411_v33, %v411_v33 }
 0x319   : > { %v531_v35 = vunpack.c.l.b16 %v415_v34 }
 0x31b   : > { %v532_v36 = vpack.c.b16 %v531_v35, %v531_v35 }
 0x31d   : > { %533 = vrot.lane.b32.xlu2 %v532_v36, %s776_s14 }
 0x31e   : > { %v413_v37 = vpop.f32.mrf.mxu2 }
 0x332   : > { %v525_v38 = vpop.f32.mrf.mxu2 }
 0x333   : > { %v529_v39 = vpack.c.bf16 %v525_v38, %v525_v38 }
 0x335   : > { %v541_v40 = vunpack.c.l.b16 %v529_v39 }
 0x337   : > { %v542_v41 = vpack.c.b16 %v541_v40, %v541_v40 }
 0x339   : > { %v468_v42 = vpop.f32.mrf.mxu0  ;;  %543 = vrot.lane.b32.xlu2 %v542_v41, %s777_s15 }
 0x33a   : > { %v472_v43 = vpack.c.bf16 %v468_v42, %v468_v42  ;;  %v527_v44 = vpop.f32.mrf.mxu2 }
 0x33c   : > { %v536_v45 = vunpack.c.l.b16 %v472_v43 }
 0x33e   : > { %v537_v46 = vpack.c.b16 %v536_v45, %v536_v45 }
 0x340   : > { %538 = vrot.lane.b32.xlu0 %v537_v46, %s778_s17 }
 0x341   : > { %v470_v47 = vpop.f32.mrf.mxu0 }
 0x377   : > { %v534_v48 = vpop.permute.xlu2 %533 }
 0x378   : > { %v547_v50 = vsel %vm297_vm1, %v349_v49, %v534_v48 }
 0x393   : > { %v544_v52 = vpop.permute.xlu2 %543 }
 0x3b2   : > { %v539_v51 = vpop.permute.xlu0 %538 }
 0x3b3   : > { %v550_v53 = vsel %vm548_vm3, %v547_v50, %v539_v51 }
 0x3b4   : > { %v553_v54 = vsel %vm551_vm4, %v550_v53, %v544_v52 }
 0x3b5   : > { %556 = vst.msk [vmem:[%s182_s21] sm:$0xf] %vm555_vm5, %v553_v54 }
 0x3b6 PF: > { %s14_s12 = sadd.s32 1, %s768_s12  }
 0x3b7   : > { %p11_p7 = scmp.ge.s32.totalorder %s14_s12, 4  }
 0x3b9   :  { %13 = sbr.rel (!%p11_p7) target bundleno = 1 (0x1), region = 71 }
 0x3be   :  { %576 = vsyncpa [#allocation3], 1 }
 0x3bf   :  { %578 = vsyncpa [#allocation3 + $0x1], 1 }

// kernel: transformer_encoder_layer.5
= control target key start
LH: loop header
LB: loop body
LE: loop exit
PB: predicated region body
PF: predicated region fallthrough
CT: control target
= control target key end

     0   :  { %s570_s24 = smov 0   ;;  %s625_s0 = inlined_call_operand.vmem [shape: bf16[16,32], index: 0, kind: input, shape index: {}]   ;;  %s626_s1 = inlined_call_operand.vmem [shape: bf16[32,64], index: 1, kind: input, shape index: {}]   ;;  %s627_s2 = inlined_call_operand.vmem [shape: f32[1,64], index: 2, kind: input, shape index: {}]   ;;  %s628_s3 = inlined_call_operand.vmem [shape: bf16[64,32], index: 3, kind: input, shape index: {}]   ;;  %s629_s4 = inlined_call_operand.vmem [shape: f32[1,32], index: 4, kind: input, shape index: {}]   ;;  %s630_s5 = inlined_call_operand.vmem [shape: f32[1,32], index: 5, kind: input, shape index: {}]   ;;  %s631_s6 = inlined_call_operand.vmem [shape: f32[1,32], index: 6, kind: input, shape index: {}]   ;;  %s632_s7 = inlined_call_operand.vmem [shape: f32[16,32], index: 7, kind: output, shape index: {}]  }
   0x1 LB: > { %s463_s25 = sadd.s32 4294967295, %s527_s24   ;;  %p467_p0 = scmp.ge.s32.totalorder %s527_s24, 1  ;;  %s527_s24 = sphi %s570_s24, %s17_s24  }
   0x2   : > { %p236_p1 = scmp.lt.s32.totalorder %s527_s24, 3 }
   0x4   : > { %p237_p2 = pnand %p467_p0, %p236_p1 }
   0x5   : > { %p266_p3 = scmp.lt.s32.totalorder (!%p237_p2), %s463_s25, 1 }
   0x6   : > { %240 = sbr.rel (%p237_p2) target bundleno = 550 (0x226), region = 48 }
   0xb   : > { %v499_v0 = vld [vmem:[%s626_s1 + $0x8] sm:$0xff]  ;;  %v503_v1 = vld [vmem:[%s628_s3 + $0x18] sm:$0xff]  ;;  %v498_v2 = vld [vmem:[%s626_s1] sm:$0xff]  ;;  %s634_s25 = smov (!%p266_p3, %s463_s25), 1  ;;  %vm296_vm0 = vcmask 261120   ;;  %vm351_vm1 = vcmask 523264  }
   0xc   : > { %306 = vmatpush.bf16.msra.mxu0 %v499_v0  ;;  %359 = vmatpush.bf16.msra.mxu1 %v503_v1  ;;  %v502_v3 = vld [vmem:[%s628_s3 + $0x10] sm:$0xff]  ;;  %s468_s11 = sshll.u32 %s634_s25, 2  ;;  %v501_v5 = vld [vmem:[%s628_s3 + $0x8] sm:$0xff]  ;;  %v500_v6 = vld [vmem:[%s628_s3] sm:$0xff]  ;;  %v529_v20 = vmov 32.0   ;;  %s469_s27 = sshll.u32 %s634_s25, 3 }
   0xd   : > { %s269_s14 = scalar_lea.vmem %s625_s0, %s468_s11  ;;  %v513_v7 = vld [vmem:[%s627_s2] ss:$0 sm:$0xff]  ;;  %517 = vrcp.f32 %v529_v20  ;;  %s273_s9 = scalar_lea.vmem %s632_s7, %s469_s27 }
   0xe   : > { %v275_v4 = vld [vmem:[%s269_s14] sm:$0xf] }
   0xf   : > { %v514_v13 = vld [vmem:[%s629_s4] ss:$0 sm:$0xff]  ;;  %v368_v14 = vunpack.c.l.bf16 %v275_v4 }
  0x10   : > { %307 = vmatpush.bf16.msra.mxu0 %v498_v2  ;;  %360 = vmatpush.bf16.msra.mxu1 %v502_v3  ;;  %v515_v41 = vld [vmem:[%s630_s5] ss:$0 sm:$0xff] }
  0x11   : > { %v516_v43 = vld [vmem:[%s631_s6] ss:$0 sm:$0xff] }
  0x13   : > { %478 = vmatmul.msk.bf16.vlgmr.msra.gmra.mxu0 %vm296_vm0, %v275_v4  ;;  %v518_v21 = vpop.eup %517 }
  0x14   : > { %361 = vmatpush.bf16.msra.mxu1 %v501_v5  ;;  %v374_v22 = vmul.f32 32.0, %v518_v21  ;;  %vm378_vm2 = vweird.f32 %v518_v21 }
  0x16   : > { %v375_v23 = vsub.f32 1.0, %v374_v22 }
  0x18   : > { %362 = vmatpush.bf16.msra.mxu1 %v500_v6  ;;  %v376_v24 = vmul.f32 %v518_v21, %v375_v23 }
  0x1a   : > { %v377_v25 = vadd.f32 %v518_v21, %v376_v24 }
  0x1c   : > { %v379_v26 = vsel %vm378_vm2, %v518_v21, %v377_v25 }
  0x90   : > { %v309_v8 = vpop.f32.mrf.mxu0 }
  0x91   : > { %v310_v9 = vadd.f32 %v513_v7, %v309_v8 }
  0x93   : > { %v313_v10 = vmax.f32 %v310_v9, 0.0 }
  0x95   : > { %v314_v11 = vpack.c.bf16 %v313_v10, %v313_v10 }
  0x97   : > { %495 = vmatmul.msk.bf16.vlgmr.msra.gmra.mxu1 %vm351_vm1, %v314_v11 }
  0x98   : > { %v311_v12 = vpop.f32.mrf.mxu0 }
 0x114   : > { %v364_v15 = vpop.f32.mrf.mxu1 }
 0x115   : > { %v365_v16 = vadd.f32 %v514_v13, %v364_v15 }
 0x117   : > { %v369_v17 = vadd.f32 %v368_v14, %v365_v16 }
 0x119   : > { %v370_v18 = vsel %vm296_vm0, %v369_v17, 0.0 }
 0x11a   : > { %371 = vadd.xlane.f32.xlu0 %v370_v18 }
 0x11c   : > { %v366_v19 = vpop.f32.mrf.mxu1 }
 0x18d   : > { %v372_v27 = vpop.xlane.xlu0 %371 }
 0x18e   : > { %v380_v28 = vmul.f32 %v379_v26, %v372_v27 }
 0x190   : > { %v381_v29 = vsub.f32 %v369_v17, %v380_v28 }
 0x192   : > { %v382_v30 = vmul.f32 %v381_v29, %v381_v29 }
 0x194   : > { %v383_v31 = vsel %vm296_vm0, %v382_v30, 0.0 }
 0x195   : > { %384 = vadd.xlane.f32.xlu0 %v383_v31 }
 0x208   : > { %v385_v32 = vpop.xlane.xlu0 %384 }
 0x209   : > { %v386_v33 = vmul.f32 %v385_v32, %v379_v26 }
 0x20b   : > { %v387_v34 = vadd.f32 1e-05, %v386_v33 }
 0x20d   : > { %519 = vrsqrt.f32 %v387_v34  ;;  %vm394_vm4 = vweird.f32 %v387_v34 }
 0x213   : > { %v520_v35 = vpop.eup %519 }
 0x214   : > { %v389_v36 = vmul.f32 %v520_v35, %v387_v34  ;;  %vm395_vm3 = vweird.f32 %v520_v35 }
 0x215   : > { %vm396_vm5 = vmor %vm394_vm4, %vm395_vm3 }
 0x216   : > { %v390_v37 = vmul.f32 %v520_v35, %v389_v36 }
 0x218   : > { %v391_v38 = vmul.f32 0.5, %v390_v37 }
 0x21a   : > { %v392_v39 = vsub.f32 1.5, %v391_v38 }
 0x21c   : > { %v393_v40 = vmul.f32 %v520_v35, %v392_v39 }
 0x21e   : > { %v397_v42 = vsel %vm396_vm5, %v520_v35, %v393_v40 }
 0x21f   : > { %v398_v44 = vmul.f32 %v397_v42, %v381_v29 }
 0x221   : > { %v403_v45 = vmul.f32 %v515_v41, %v398_v44 }
 0x223   : > { %v408_v46 = vadd.f32 %v516_v43, %v403_v45 }
 0x225   : > { %409 = vst.msk [vmem:[%s273_s9] sm:$0xff] %vm296_vm0, %v408_v46 }
 0x226 PF: > { %s17_s24 = sadd.s32 1, %s527_s24  }
 0x227   : > { %p14_p4 = scmp.ge.s32.totalorder %s17_s24, 4  }
 0x229   :  { %16 = sbr.rel (!%p14_p4) target bundleno = 1 (0x1), region = 78 }

</bundles_post_ra>
